<compile_context>
chip_gen: v7x
topology: tpu7x:2x2x1
jax: 0.10.0
libtpu: 0.0.40
codegen_flags: <defaults>
</compile_context>

<pallas_src>
import jax
import jax.numpy as jnp
from jax.experimental import pallas as pl
from jax.experimental.pallas import tpu as pltpu


def _round_up(x: int, m: int) -> int:
    return (x + m - 1) // m * m


def _make_fused_kernel(apply_dropout: bool):
    def kernel(seed_ref, a_ref, x_ref, w0_ref, b0_ref, ws1_ref, wn1_ref,
               b1_ref, o_ref):
        a = a_ref[...]                       # (NP, NP)  bf16, row-normalized
        x = x_ref[...]                       # (NP, FP)  bf16

        # ---- layer 0: mean aggregation + fused [self | neigh] projection ----
        h_neigh = jnp.dot(a, x, preferred_element_type=jnp.float32)
        h_neigh = h_neigh.astype(jnp.bfloat16)                   # (NP, FP)
        h_cat = jnp.concatenate([x, h_neigh], axis=1)            # (NP, 2*FP)
        h1 = jnp.dot(h_cat, w0_ref[...],
                     preferred_element_type=jnp.float32) + b0_ref[...]  # (NP, HP)

        # ReLU in f32
        h1 = jnp.maximum(h1, 0.0)

        if apply_dropout:
            # Dropout(p=0.5), train mode. Stateless integer-hash PRNG keyed by
            # (row, col, seed); keep w.p. 0.5. The 1/(1-p) = 2 scale is folded
            # into the layer-1 weights by the wrapper, so only mask here.
            rows = jax.lax.broadcasted_iota(jnp.int32, h1.shape, 0)
            cols = jax.lax.broadcasted_iota(jnp.int32, h1.shape, 1)
            rows = rows.astype(jnp.uint32)
            cols = cols.astype(jnp.uint32)
            s = seed_ref[0].astype(jnp.uint32)
            bits = (rows * jnp.uint32(0x9E3779B1)
                    + cols * jnp.uint32(0x85EBCA77)
                    + s * jnp.uint32(0xC2B2AE3D)
                    + jnp.uint32(0x27D4EB2F))
            bits = bits ^ (bits >> 16)
            bits = bits * jnp.uint32(0x7FEB352D)
            bits = bits ^ (bits >> 15)
            bits = bits * jnp.uint32(0x846CA68B)
            bits = bits ^ (bits >> 16)
            keep = (bits >> 31) == jnp.uint32(0)      # Bernoulli(0.5)
            h1 = jnp.where(keep, h1, 0.0)

        h1b = h1.astype(jnp.bfloat16)

        # ---- layer 1 (reassociated): out = h1 @ Ws1 + A @ (h1 @ Wn1) + b1 ----
        hn1 = jnp.dot(h1b, wn1_ref[...],
                      preferred_element_type=jnp.float32).astype(jnp.bfloat16)
        agg = jnp.dot(a, hn1, preferred_element_type=jnp.float32)     # (NP, CP)
        slf = jnp.dot(h1b, ws1_ref[...], preferred_element_type=jnp.float32)
        o_ref[...] = (slf + agg + b1_ref[...]).astype(o_ref.dtype)

    return kernel


def graphsage_forward(adj_mean, x, params, *, training: bool = True, seed: int = 0):
    """Fused 2-layer GraphSAGE forward in a single pallas_call."""
    (ws0, wn0, b0), (ws1, wn1, b1) = params
    n, fin = x.shape
    hid = ws0.shape[0]
    ncls = ws1.shape[0]

    npad = _round_up(n, 128)      # N appears on both lane (A cols) and sublane axes
    fpad = _round_up(fin, 128)
    hpad = _round_up(hid, 128)
    cpad = _round_up(ncls, 128)

    # Inputs padded to lane-dense slabs (zeros cannot contaminate real rows:
    # padded A rows/cols and padded feature columns are all zero).
    a_bf = jnp.pad(adj_mean.astype(jnp.float32),
                   ((0, npad - n), (0, npad - n))).astype(jnp.bfloat16)
    x_bf = jnp.pad(x.astype(jnp.float32),
                   ((0, npad - n), (0, fpad - fin))).astype(jnp.bfloat16)

    # Layer 0: stack [Ws0; Wn0] so both projections are one MXU matmul, with
    # each block padded to FPAD rows so it lines up with the in-kernel concat.
    ws0_p = jnp.pad(ws0.T.astype(jnp.float32), ((0, fpad - fin), (0, hpad - hid)))
    wn0_p = jnp.pad(wn0.T.astype(jnp.float32), ((0, fpad - fin), (0, hpad - hid)))
    w0 = jnp.concatenate([ws0_p, wn0_p], axis=0).astype(jnp.bfloat16)   # (2*FP, HP)
    b0p = jnp.pad(b0.astype(jnp.float32), (0, hpad - hid)).reshape(1, hpad)

    # Fold the dropout keep-scale into the (linear) layer-1 weights.
    scale = 2.0 if training else 1.0
    ws1p = jnp.pad(ws1.T.astype(jnp.float32) * scale,
                   ((0, hpad - hid), (0, cpad - ncls))).astype(jnp.bfloat16)
    wn1p = jnp.pad(wn1.T.astype(jnp.float32) * scale,
                   ((0, hpad - hid), (0, cpad - ncls))).astype(jnp.bfloat16)
    b1p = jnp.pad(b1.astype(jnp.float32), (0, cpad - ncls)).reshape(1, cpad)

    seed_arr = jnp.array([seed], dtype=jnp.int32)

    kernel = _make_fused_kernel(apply_dropout=training)

    grid_spec = pltpu.PrefetchScalarGridSpec(
        num_scalar_prefetch=1,               # seed -> SMEM ref
        grid=(1,),                           # everything fits VMEM at this size
        in_specs=[
            pl.BlockSpec((npad, npad), lambda i, s: (0, 0)),        # A
            pl.BlockSpec((npad, fpad), lambda i, s: (0, 0)),        # X
            pl.BlockSpec((2 * fpad, hpad), lambda i, s: (0, 0)),    # [Ws0; Wn0]
            pl.BlockSpec((1, hpad), lambda i, s: (0, 0)),           # b0
            pl.BlockSpec((hpad, cpad), lambda i, s: (0, 0)),        # Ws1
            pl.BlockSpec((hpad, cpad), lambda i, s: (0, 0)),        # Wn1
            pl.BlockSpec((1, cpad), lambda i, s: (0, 0)),           # b1
        ],
        out_specs=pl.BlockSpec((npad, cpad), lambda i, s: (0, 0)),
    )

    out = pl.pallas_call(
        kernel,
        grid_spec=grid_spec,
        out_shape=jax.ShapeDtypeStruct((npad, cpad), jnp.float32),
        compiler_params=pltpu.CompilerParams(
            dimension_semantics=("arbitrary",)),
    )(seed_arr, a_bf, x_bf, w0, b0p, ws1p, wn1p, b1p)

    return out[:n, :ncls]


# ------------------------- reference / data builders -------------------------

def reference_forward(adj_mean, x, params):
    """Pure-JAX f32 reference (eval mode: no dropout)."""
    h = x
    n_layers = len(params)
    for l, (ws, wn, b) in enumerate(params):
        h_neigh = adj_mean @ h
        h = h @ ws.T + h_neigh @ wn.T + b
        if l != n_layers - 1:
            h = jnp.maximum(h, 0.0)
    return h


def _init_linear(key, out_feats, in_feats):
    kw, _ = jax.random.split(key)
    limit = (6.0 / (in_feats + out_feats)) ** 0.5
    w = jax.random.uniform(kw, (out_feats, in_feats), jnp.float32, -limit, limit)
    b = jnp.zeros((out_feats,), jnp.float32)
    return w, b


def build_params(key, in_feats, n_hidden, n_classes):
    k0, k1, k2, k3 = jax.random.split(key, 4)
    ws0, b0 = _init_linear(k0, n_hidden, in_feats)
    wn0, _ = _init_linear(k1, n_hidden, in_feats)
    ws1, b1 = _init_linear(k2, n_classes, n_hidden)
    wn1, _ = _init_linear(k3, n_classes, n_hidden)
    return [(ws0, wn0, b0), (ws1, wn1, b1)]   # per layer: (W_self, W_neigh, bias)


def build_mean_adjacency(key, n_nodes, edge_prob=0.15):
    """Dense random graph; row-normalize so A_mean @ H == mean over in-neighbors."""
    a = (jax.random.uniform(key, (n_nodes, n_nodes)) < edge_prob).astype(jnp.float32)
    a = a * (1.0 - jnp.eye(n_nodes, dtype=jnp.float32))     # no self-loops
    deg = jnp.sum(a, axis=1, keepdims=True)
    return a / jnp.maximum(deg, 1.0)                        # isolated nodes -> zero row


if __name__ == "__main__":
    N = 64          # nodes
    IN_FEATS = 16
    N_HIDDEN = 32
    N_CLASSES = 8

    root = jax.random.PRNGKey(0)
    k_adj, k_x, k_params = jax.random.split(root, 3)

    adj_mean = build_mean_adjacency(k_adj, N)
    x = jax.random.normal(k_x, (N, IN_FEATS), jnp.float32)
    params = build_params(k_params, IN_FEATS, N_HIDDEN, N_CLASSES)

    # Eval-mode correctness check against the pure-JAX reference
    # (loose tolerance: matmul operands are bf16 in the kernel).
    out_eval = jax.block_until_ready(
        graphsage_forward(adj_mean, x, params, training=False, seed=0))
    ref = reference_forward(adj_mean, x, params)
    assert out_eval.shape == (N, N_CLASSES), out_eval.shape
    max_err = float(jnp.max(jnp.abs(out_eval - ref)))
    assert max_err < 0.3, f"max abs err vs reference: {max_err}"

    # Training-mode run (fused ReLU + Dropout(0.5)).
    out = jax.block_until_ready(
        graphsage_forward(adj_mean, x, params, training=True, seed=0))
    assert out.shape == (N, N_CLASSES), out.shape
    assert bool(jnp.all(jnp.isfinite(out)))
    print("KERNEL_OK")
</pallas_src>

<mosaic_0001>
module attributes {stable_mosaic.version = 11 : i64} {
  func.func @kernel(%arg0: i32, %arg1: memref<1xi32, #tpu.memory_space<smem>>, %arg2: memref<128x128xbf16, #tpu.memory_space<vmem>>, %arg3: memref<128x128xbf16, #tpu.memory_space<vmem>>, %arg4: memref<256x128xbf16, #tpu.memory_space<vmem>>, %arg5: memref<1x128xf32, #tpu.memory_space<vmem>>, %arg6: memref<128x128xbf16, #tpu.memory_space<vmem>>, %arg7: memref<128x128xbf16, #tpu.memory_space<vmem>>, %arg8: memref<1x128xf32, #tpu.memory_space<vmem>>, %arg9: memref<128x128xf32, #tpu.memory_space<vmem>>) attributes {dimension_semantics = [#tpu.dimension_semantics<arbitrary>], iteration_bounds = array<i64: 1>, scalar_prefetch = 1 : i64, scratch_operands = 0 : i64, tpu.core_type = #tpu.core_type<tc>, window_params = [{pipeline_mode = #tpu.pipeline_mode<synchronous>, transform_indices = @transform_0, window_bounds = array<i64: 128, 128>}, {pipeline_mode = #tpu.pipeline_mode<synchronous>, transform_indices = @transform_1, window_bounds = array<i64: 128, 128>}, {pipeline_mode = #tpu.pipeline_mode<synchronous>, transform_indices = @transform_2, window_bounds = array<i64: 256, 128>}, {pipeline_mode = #tpu.pipeline_mode<synchronous>, transform_indices = @transform_3, window_bounds = array<i64: 1, 128>}, {pipeline_mode = #tpu.pipeline_mode<synchronous>, transform_indices = @transform_4, window_bounds = array<i64: 128, 128>}, {pipeline_mode = #tpu.pipeline_mode<synchronous>, transform_indices = @transform_5, window_bounds = array<i64: 128, 128>}, {pipeline_mode = #tpu.pipeline_mode<synchronous>, transform_indices = @transform_6, window_bounds = array<i64: 1, 128>}, {pipeline_mode = #tpu.pipeline_mode<synchronous>, transform_indices = @transform_7, window_bounds = array<i64: 128, 128>}]} {
    %c0 = arith.constant 0 : index
    %c0_0 = arith.constant 0 : index
    %0 = vector.load %arg2[%c0, %c0_0] : memref<128x128xbf16, #tpu.memory_space<vmem>>, vector<128x128xbf16>
    %c0_1 = arith.constant 0 : index
    %c0_2 = arith.constant 0 : index
    %1 = vector.load %arg3[%c0_1, %c0_2] : memref<128x128xbf16, #tpu.memory_space<vmem>>, vector<128x128xbf16>
    %cst = arith.constant dense<0.000000e+00> : vector<128x128xf32>
    %2 = tpu.matmul %0, %1, %cst {dimension_numbers = #tpu.dot_dimension_numbers<[1], [0], [0], [1], [0, 0, 1, 1], [], []>} : vector<128x128xbf16>, vector<128x128xbf16>, vector<128x128xf32> -> vector<128x128xf32>
    %3 = arith.truncf %2 : vector<128x128xf32> to vector<128x128xbf16>
    %4 = tpu.concatenate %1, %3 in 1 : vector<128x128xbf16>, vector<128x128xbf16> -> vector<128x256xbf16>
    %c0_3 = arith.constant 0 : index
    %c0_4 = arith.constant 0 : index
    %5 = vector.load %arg4[%c0_3, %c0_4] : memref<256x128xbf16, #tpu.memory_space<vmem>>, vector<256x128xbf16>
    %cst_5 = arith.constant dense<0.000000e+00> : vector<128x128xf32>
    %6 = tpu.matmul %4, %5, %cst_5 {dimension_numbers = #tpu.dot_dimension_numbers<[1], [0], [0], [1], [0, 0, 1, 1], [], []>} : vector<128x256xbf16>, vector<256x128xbf16>, vector<128x128xf32> -> vector<128x128xf32>
    %c0_6 = arith.constant 0 : index
    %c0_7 = arith.constant 0 : index
    %7 = vector.load %arg5[%c0_6, %c0_7] : memref<1x128xf32, #tpu.memory_space<vmem>>, vector<1x128xf32>
    %8 = vector.broadcast %7 : vector<1x128xf32> to vector<128x128xf32>
    %9 = arith.addf %6, %8 : vector<128x128xf32>
    %cst_8 = arith.constant 0.000000e+00 : f32
    %10 = vector.broadcast %cst_8 : f32 to vector<128x128xf32>
    %11 = arith.maximumf %9, %10 : vector<128x128xf32>
    %12 = arith.truncf %11 : vector<128x128xf32> to vector<128x128xbf16>
    %c0_9 = arith.constant 0 : index
    %c0_10 = arith.constant 0 : index
    %13 = vector.load %arg7[%c0_9, %c0_10] : memref<128x128xbf16, #tpu.memory_space<vmem>>, vector<128x128xbf16>
    %cst_11 = arith.constant dense<0.000000e+00> : vector<128x128xf32>
    %14 = tpu.matmul %12, %13, %cst_11 {dimension_numbers = #tpu.dot_dimension_numbers<[1], [0], [0], [1], [0, 0, 1, 1], [], []>} : vector<128x128xbf16>, vector<128x128xbf16>, vector<128x128xf32> -> vector<128x128xf32>
    %15 = arith.truncf %14 : vector<128x128xf32> to vector<128x128xbf16>
    %cst_12 = arith.constant dense<0.000000e+00> : vector<128x128xf32>
    %16 = tpu.matmul %0, %15, %cst_12 {dimension_numbers = #tpu.dot_dimension_numbers<[1], [0], [0], [1], [0, 0, 1, 1], [], []>} : vector<128x128xbf16>, vector<128x128xbf16>, vector<128x128xf32> -> vector<128x128xf32>
    %c0_13 = arith.constant 0 : index
    %c0_14 = arith.constant 0 : index
    %17 = vector.load %arg6[%c0_13, %c0_14] : memref<128x128xbf16, #tpu.memory_space<vmem>>, vector<128x128xbf16>
    %cst_15 = arith.constant dense<0.000000e+00> : vector<128x128xf32>
    %18 = tpu.matmul %12, %17, %cst_15 {dimension_numbers = #tpu.dot_dimension_numbers<[1], [0], [0], [1], [0, 0, 1, 1], [], []>} : vector<128x128xbf16>, vector<128x128xbf16>, vector<128x128xf32> -> vector<128x128xf32>
    %19 = arith.addf %18, %16 : vector<128x128xf32>
    %c0_16 = arith.constant 0 : index
    %c0_17 = arith.constant 0 : index
    %20 = vector.load %arg8[%c0_16, %c0_17] : memref<1x128xf32, #tpu.memory_space<vmem>>, vector<1x128xf32>
    %21 = vector.broadcast %20 : vector<1x128xf32> to vector<128x128xf32>
    %22 = arith.addf %19, %21 : vector<128x128xf32>
    %c0_18 = arith.constant 0 : index
    %c0_19 = arith.constant 0 : index
    %23 = vector.load %arg9[%c0_18, %c0_19] : memref<128x128xf32, #tpu.memory_space<vmem>>, vector<128x128xf32>
    tpu.vector_store %arg9[%c0_18, %c0_19], %22 {strides = array<i32>} : memref<128x128xf32, #tpu.memory_space<vmem>>, vector<128x128xf32>,
    return
  }
  func.func @transform_0(%arg0: i32, %arg1: memref<1xi32, #tpu.memory_space<smem>>) -> (i32, i32) {
    %c0_i32 = arith.constant 0 : i32
    %c0_i32_0 = arith.constant 0 : i32
    %c0_i32_1 = arith.constant 0 : i32
    return %c0_i32, %c0_i32_0 : i32, i32
  }
  func.func @transform_1(%arg0: i32, %arg1: memref<1xi32, #tpu.memory_space<smem>>) -> (i32, i32) {
    %c0_i32 = arith.constant 0 : i32
    %c0_i32_0 = arith.constant 0 : i32
    %c0_i32_1 = arith.constant 0 : i32
    return %c0_i32, %c0_i32_0 : i32, i32
  }
  func.func @transform_2(%arg0: i32, %arg1: memref<1xi32, #tpu.memory_space<smem>>) -> (i32, i32) {
    %c0_i32 = arith.constant 0 : i32
    %c0_i32_0 = arith.constant 0 : i32
    %c0_i32_1 = arith.constant 0 : i32
    return %c0_i32, %c0_i32_0 : i32, i32
  }
  func.func @transform_3(%arg0: i32, %arg1: memref<1xi32, #tpu.memory_space<smem>>) -> (i32, i32) {
    %c0_i32 = arith.constant 0 : i32
    %c0_i32_0 = arith.constant 0 : i32
    %c0_i32_1 = arith.constant 0 : i32
    return %c0_i32, %c0_i32_0 : i32, i32
  }
  func.func @transform_4(%arg0: i32, %arg1: memref<1xi32, #tpu.memory_space<smem>>) -> (i32, i32) {
    %c0_i32 = arith.constant 0 : i32
    %c0_i32_0 = arith.constant 0 : i32
    %c0_i32_1 = arith.constant 0 : i32
    return %c0_i32, %c0_i32_0 : i32, i32
  }
  func.func @transform_5(%arg0: i32, %arg1: memref<1xi32, #tpu.memory_space<smem>>) -> (i32, i32) {
    %c0_i32 = arith.constant 0 : i32
    %c0_i32_0 = arith.constant 0 : i32
    %c0_i32_1 = arith.constant 0 : i32
    return %c0_i32, %c0_i32_0 : i32, i32
  }
  func.func @transform_6(%arg0: i32, %arg1: memref<1xi32, #tpu.memory_space<smem>>) -> (i32, i32) {
    %c0_i32 = arith.constant 0 : i32
    %c0_i32_0 = arith.constant 0 : i32
    %c0_i32_1 = arith.constant 0 : i32
    return %c0_i32, %c0_i32_0 : i32, i32
  }
  func.func @transform_7(%arg0: i32, %arg1: memref<1xi32, #tpu.memory_space<smem>>) -> (i32, i32) {
    %c0_i32 = arith.constant 0 : i32
    %c0_i32_0 = arith.constant 0 : i32
    %c0_i32_1 = arith.constant 0 : i32
    return %c0_i32, %c0_i32_0 : i32, i32
  }
}

</mosaic_0001>

<bundles_post_ra>
// kernel: tpu_custom_call.1
= control target key start
LH: loop header
LB: loop body
LE: loop exit
PB: predicated region body
PF: predicated region fallthrough
CT: control target
= control target key end

     0   :  { %14 = vsyncpa [#allocation5], 0  ;;  %s1876_s0 = inlined_call_operand.<no memory space> [shape: s32[1], index: 0, kind: input, shape index: {}]   ;;  %s1877_s1 = inlined_call_operand.hbm [shape: bf16[128,128], index: 1, kind: input, shape index: {}]   ;;  %s1878_s2 = inlined_call_operand.hbm [shape: bf16[128,128], index: 2, kind: input, shape index: {}]   ;;  %s1879_s3 = inlined_call_operand.hbm [shape: bf16[256,128], index: 3, kind: input, shape index: {}]   ;;  %s1880_s4 = inlined_call_operand.vmem [shape: f32[1,128], index: 4, kind: input, shape index: {}]   ;;  %s1881_s5 = inlined_call_operand.hbm [shape: bf16[128,128], index: 5, kind: input, shape index: {}]   ;;  %s1882_s6 = inlined_call_operand.hbm [shape: bf16[128,128], index: 6, kind: input, shape index: {}]   ;;  %s1883_s7 = inlined_call_operand.vmem [shape: f32[1,128], index: 7, kind: input, shape index: {}]   ;;  %s1884_s8 = inlined_call_operand.hbm [shape: f32[128,128], index: 8, kind: output, shape index: {}]  }
   0x1   :  { %15 = vsyncpa [#allocation8], 0 }
   0x2   :  { %16 = vsyncpa [#allocation11], 0 }
   0x3   :  { %17 = vsyncpa [#allocation6], 0  ;;  %s1592_s26 = smov [#allocation7]   ;;  %s1593_s28 = smov [#allocation10]  }
   0x4   :  { %s35_s27 = sshll.u32 %s1592_s26, 4  ;;  %s61_s29 = sshll.u32 %s1593_s28, 4  ;;  %s36_s27 = int_to_ptr.vmem [resolvable:$true] %s35_s27  ;;  %s1647_s29 = int_to_ptr.vmem [resolvable:$true] %s61_s29 }
   0x5   :  { %s1452_s10 = scalar_lea.hbm %s1878_s2, 1024 }
   0x6   :  { %p1453_p0 = scmp.ne.s32.totalorder %s1878_s2, %s1452_s10  ;;  %p1456_p1 = scmp.lt.u32.totalorder %s1452_s10, %s1878_s2 }
   0x8   :  { %p1458_p2 = pnand %p1456_p1, %p1453_p0 }
   0xa   :  { %1461 = shalt.err (!%p1458_p2)
}
   0xb   :  { %s1462_s15 = scalar_lea.vmem %s36_s27, 1024  ;;  %p1467_p4 = scmp.lt.s32.totalorder %s36_s27, %s36_s27 }
   0xc   :  { %p1463_p3 = scmp.ne.s32.totalorder %s36_s27, %s1462_s15  ;;  %p1468_p5 = scmp.lt.s32.totalorder %s1462_s15, %s1462_s15 }
   0xe   :  { %p1469_p6 = por %p1468_p5, %p1467_p4 }
  0x10   :  { %p1470_p7 = pnand %p1469_p6, %p1463_p3 }
  0x12   :  { %1473 = shalt.err (!%p1470_p7)
}
  0x13   :  { %s1594_s16 = smov 64   ;;  %s1595_s17 = smov 4  }
  0x14   :  { %41 = dma.hbm_to_vmem [thread:$0]  %s1878_s2, 1024, %s36_s27, [#allocation8], %s1594_s16, %s1594_s16, %s1595_s17  }
  0x15   :  { %s1474_s22 = scalar_lea.hbm %s1881_s5, 1024 }
  0x16   :  { %p1475_p8 = scmp.ne.s32.totalorder %s1881_s5, %s1474_s22  ;;  %p1478_p9 = scmp.lt.u32.totalorder %s1474_s22, %s1881_s5 }
  0x18   :  { %p1480_p10 = pnand %p1478_p9, %p1475_p8 }
  0x1a   :  { %1483 = shalt.err (!%p1480_p10)
}
  0x1b   :  { %s1484_s26 = scalar_lea.vmem %s1647_s29, 1024  ;;  %p1489_p12 = scmp.lt.s32.totalorder %s1647_s29, %s1647_s29 }
  0x1c   :  { %p1485_p11 = scmp.ne.s32.totalorder %s1647_s29, %s1484_s26  ;;  %p1490_p13 = scmp.lt.s32.totalorder %s1484_s26, %s1484_s26 }
  0x1e   :  { %p1491_p0 = por %p1490_p13, %p1489_p12 }
  0x20   :  { %p1492_p1 = pnand %p1491_p0, %p1485_p11 }
  0x22   :  { %1495 = shalt.err (!%p1492_p1)
}
  0x23   :  { %67 = dma.hbm_to_vmem [thread:$0]  %s1881_s5, 1024, %s1647_s29, [#allocation11], %s1594_s16, %s1594_s16, %s1595_s17  }
  0x24   :  { %s1596_s28 = smov [#allocation4]   ;;  %s1597_s9 = smov [#allocation9]  }
  0x25   :  { %s23_s30 = sshll.u32 %s1596_s28, 4  ;;  %s47_s10 = sshll.u32 %s1597_s9, 4  ;;  %s24_s30 = int_to_ptr.vmem [resolvable:$true] %s23_s30  ;;  %s1684_s10 = int_to_ptr.vmem [resolvable:$true] %s47_s10 }
  0x26   :  { %s1496_s13 = scalar_lea.hbm %s1877_s1, 1024 }
  0x27   :  { %p1497_p2 = scmp.ne.s32.totalorder %s1877_s1, %s1496_s13  ;;  %p1500_p3 = scmp.lt.u32.totalorder %s1496_s13, %s1877_s1 }
  0x29   :  { %p1502_p4 = pnand %p1500_p3, %p1497_p2 }
  0x2b   :  { %1505 = shalt.err (!%p1502_p4)
}
  0x2c   :  { %s1506_s5 = scalar_lea.vmem %s24_s30, 1024  ;;  %p1511_p6 = scmp.lt.s32.totalorder %s24_s30, %s24_s30 }
  0x2d   :  { %p1507_p5 = scmp.ne.s32.totalorder %s24_s30, %s1506_s5  ;;  %p1512_p7 = scmp.lt.s32.totalorder %s1506_s5, %s1506_s5 }
  0x2f   :  { %p1513_p8 = por %p1512_p7, %p1511_p6 }
  0x31   :  { %p1514_p9 = pnand %p1513_p8, %p1507_p5 }
  0x33   :  { %1517 = shalt.err (!%p1514_p9)
}
  0x34   :  { %29 = dma.hbm_to_vmem [thread:$0]  %s1877_s1, 1024, %s24_s30, [#allocation5], %s1594_s16, %s1594_s16, %s1595_s17  }
  0x35   :  { %s1518_s23 = scalar_lea.hbm %s1879_s3, 2048 }
  0x36   :  { %p1519_p10 = scmp.ne.s32.totalorder %s1879_s3, %s1518_s23  ;;  %p1522_p11 = scmp.lt.u32.totalorder %s1518_s23, %s1879_s3 }
  0x38   :  { %p1524_p12 = pnand %p1522_p11, %p1519_p10 }
  0x3a   :  { %1527 = shalt.err (!%p1524_p12)
}
  0x3b   :  { %s1528_s2 = scalar_lea.vmem %s1684_s10, 2048  ;;  %p1533_p0 = scmp.lt.s32.totalorder %s1684_s10, %s1684_s10 }
  0x3c   :  { %p1529_p13 = scmp.ne.s32.totalorder %s1684_s10, %s1528_s2  ;;  %p1534_p1 = scmp.lt.s32.totalorder %s1528_s2, %s1528_s2 }
  0x3e   :  { %p1535_p2 = por %p1534_p1, %p1533_p0 }
  0x40   :  { %p1536_p3 = pnand %p1535_p2, %p1529_p13 }
  0x42   :  { %1539 = shalt.err (!%p1536_p3)
}
  0x43   :  { %53 = dma.hbm_to_vmem [thread:$0]  %s1879_s3, 2048, %s1684_s10, [#allocation8], %s1594_s16, %s1594_s16, %s1595_s17  }
  0x44   :  { %s1598_s28 = smov [#allocation12]   ;;  %s1540_s12 = scalar_lea.hbm %s1882_s6, 1024 }
  0x45   :  { %s73_s30 = sshll.u32 %s1598_s28, 4  ;;  %p1541_p4 = scmp.ne.s32.totalorder %s1882_s6, %s1540_s12  ;;  %s74_s30 = int_to_ptr.vmem [resolvable:$true] %s73_s30 }
  0x46   :  { %p1544_p5 = scmp.lt.u32.totalorder %s1540_s12, %s1882_s6 }
  0x48   :  { %p1546_p6 = pnand %p1544_p5, %p1541_p4 }
  0x4a   :  { %1549 = shalt.err (!%p1546_p6)
}
  0x4b   :  { %s1550_s19 = scalar_lea.vmem %s74_s30, 1024  ;;  %p1555_p8 = scmp.lt.s32.totalorder %s74_s30, %s74_s30 }
  0x4c   :  { %p1551_p7 = scmp.ne.s32.totalorder %s74_s30, %s1550_s19  ;;  %p1556_p9 = scmp.lt.s32.totalorder %s1550_s19, %s1550_s19 }
  0x4e   :  { %p1557_p10 = por %p1556_p9, %p1555_p8 }
  0x50   :  { %p1558_p11 = pnand %p1557_p10, %p1551_p7 }
  0x52   :  { %1561 = shalt.err (!%p1558_p11)
}
  0x53   :  { %79 = dma.hbm_to_vmem [thread:$0]  %s1882_s6, 1024, %s74_s30, [#allocation11], %s1594_s16, %s1594_s16, %s1595_s17  }
  0x54   :  { %1584 = dma.done.wait [#allocation5], 1024  }
  0x55   :  { %1585 = vsyncadd [#allocation5], 4294966272 }
  0x56   :  { %1586 = dma.done.wait [#allocation8], 3072  }
  0x57   :  { %1587 = vsyncadd [#allocation8], 4294964224 }
  0x58   :  { %1588 = dma.done.wait [#allocation11], 2048  }
  0x59   :  { %1589 = vsyncadd [#allocation11], 4294965248  ;;  %v1736_v0 = vld [vmem:[#allocation7] sm:$0xff]   ;;  %v1738_v1 = vld [vmem:[#allocation7 + $0x8] sm:$0xff]  }
  0x5a   :  { %1250 = vmatprep.subr.bf16.mxu1 %v1736_v0  ;;  %v1743_v2 = vld [vmem:[#allocation7 + $0x10] sm:$0xff]   ;;  %v1746_v3 = vld [vmem:[#allocation7 + $0x18] sm:$0xff]   ;;  %v1749_v4 = vld [vmem:[#allocation4] sm:$0xff]  }
  0x5b   :  { %1251 = vmatpush3.bf16.msra.mxu1 %v1736_v0  ;;  %1266 = vmatprep.mubr.bf16.mxu1 %v1749_v4  ;;  %v1754_v5 = vld [vmem:[#allocation7 + $0x20] sm:$0xff]   ;;  %v1758_v6 = vld [vmem:[#allocation7 + $0x28] sm:$0xff]   ;;  %v1762_v7 = vld [vmem:[#allocation7 + $0x30] sm:$0xff]  }
  0x5c   :  { %1252 = vmatprep.subr.bf16.mxu1 %v1738_v1  ;;  %v1766_v8 = vld [vmem:[#allocation7 + $0x38] sm:$0xff]   ;;  %v1770_v9 = vld [vmem:[#allocation4 + $0x8] sm:$0xff]   ;;  %v1420_v10 = vld [vmem:[#allocation9 + $0x40] sm:$0xff]  }
  0x5d   :  { %v1772_v11 = vld [vmem:[#allocation4 + $0x10] sm:$0xff]   ;;  %v1421_v12 = vld [vmem:[#allocation9] sm:$0xff]   ;;  %v1422_v13 = vld [vmem:[#allocation9 + $0x48] sm:$0xff]  }
  0x5e   :  { %v1423_v14 = vld [vmem:[#allocation9 + $0x8] sm:$0xff]   ;;  %v1424_v15 = vld [vmem:[#allocation9 + $0x50] sm:$0xff]   ;;  %v1777_v16 = vld [vmem:[#allocation4 + $0x18] sm:$0xff]  }
  0x5f   :  { %1253 = vmatpush3.bf16.msra.mxu1 %v1738_v1  ;;  %v1779_v17 = vld [vmem:[#allocation4 + $0x20] sm:$0xff]   ;;  %v1425_v18 = vld [vmem:[#allocation9 + $0x10] sm:$0xff]   ;;  %v1426_v19 = vld [vmem:[#allocation9 + $0x58] sm:$0xff]  }
  0x60   :  { %1254 = vmatprep.subr.bf16.mxu1 %v1743_v2  ;;  %v1427_v20 = vld [vmem:[#allocation9 + $0x18] sm:$0xff]   ;;  %v1428_v21 = vld [vmem:[#allocation9 + $0x60] sm:$0xff]   ;;  %v1783_v22 = vld [vmem:[#allocation4 + $0x28] sm:$0xff]  }
  0x61   :  { %v1785_v23 = vld [vmem:[#allocation4 + $0x30] sm:$0xff]   ;;  %v1429_v24 = vld [vmem:[#allocation9 + $0x20] sm:$0xff]   ;;  %v1430_v25 = vld [vmem:[#allocation9 + $0x68] sm:$0xff]  }
  0x62   :  { %v1431_v26 = vld [vmem:[#allocation9 + $0x28] sm:$0xff]   ;;  %v1432_v27 = vld [vmem:[#allocation9 + $0x70] sm:$0xff]   ;;  %v1789_v28 = vld [vmem:[#allocation4 + $0x38] sm:$0xff]  }
  0x63   :  { %1255 = vmatpush3.bf16.msra.mxu1 %v1743_v2  ;;  %v1433_v29 = vld [vmem:[#allocation9 + $0x30] sm:$0xff]   ;;  %v1434_v30 = vld [vmem:[#allocation9 + $0x78] sm:$0xff]   ;;  %v1436_v32 = vld [vmem:[#allocation12] sm:$0xff]  }
  0x64   :  { %1256 = vmatprep.subr.bf16.mxu1 %v1746_v3  ;;  %v1435_v31 = vld [vmem:[#allocation9 + $0x38] sm:$0xff]   ;;  %v1437_v33 = vld [vmem:[#allocation12 + $0x8] sm:$0xff]   ;;  %1282 = vmatprep.subr.bf16.mxu0 %v1436_v32  ;;  %v1438_v34 = vld [vmem:[#allocation12 + $0x10] sm:$0xff]  }
  0x65   :  { %1283 = vmatpush3.bf16.msra.mxu0 %v1436_v32  ;;  %v1439_v59 = vld [vmem:[#allocation12 + $0x18] sm:$0xff]   ;;  %v1440_v60 = vld [vmem:[#allocation12 + $0x20] sm:$0xff]   ;;  %v1441_v61 = vld [vmem:[#allocation12 + $0x28] sm:$0xff]  }
  0x66   :  { %1284 = vmatprep.subr.bf16.mxu0 %v1437_v33  ;;  %v1442_v62 = vld [vmem:[#allocation12 + $0x30] sm:$0xff]   ;;  %v1443_v63 = vld [vmem:[#allocation12 + $0x38] sm:$0xff]  }
  0x67   :  { %1257 = vmatpush3.bf16.msra.mxu1 %v1746_v3 }
  0x68   :  { %1258 = vmatprep.subr.bf16.mxu1 %v1754_v5 }
  0x69   :  { %1285 = vmatpush3.bf16.msra.mxu0 %v1437_v33 }
  0x6a   :  { %1286 = vmatprep.subr.bf16.mxu0 %v1438_v34 }
  0x6b   :  { %1259 = vmatpush3.bf16.msra.mxu1 %v1754_v5 }
  0x6c   :  { %1260 = vmatprep.subr.bf16.mxu1 %v1758_v6 }
  0x6d   :  { %1287 = vmatpush3.bf16.msra.mxu0 %v1438_v34 }
  0x6e   :  { %1288 = vmatprep.subr.bf16.mxu0 %v1439_v59 }
  0x6f   :  { %1261 = vmatpush3.bf16.msra.mxu1 %v1758_v6 }
  0x70   :  { %1262 = vmatprep.subr.bf16.mxu1 %v1762_v7 }
  0x71   :  { %1289 = vmatpush3.bf16.msra.mxu0 %v1439_v59 }
  0x72   :  { %1290 = vmatprep.subr.bf16.mxu0 %v1440_v60 }
  0x73   :  { %1263 = vmatpush3.bf16.msra.mxu1 %v1762_v7 }
  0x74   :  { %1264 = vmatprep.subr.bf16.mxu1 %v1766_v8 }
  0x75   :  { %1291 = vmatpush3.bf16.msra.mxu0 %v1440_v60 }
  0x76   :  { %1292 = vmatprep.subr.bf16.mxu0 %v1441_v61 }
  0x77   :  { %1265 = vmatpush3.bf16.msra.mxu1 %v1766_v8 }
  0x78   :  { %1138 = vmatprep.subr.bf16.mxu1 %v1420_v10 }
  0x79   :  { %1293 = vmatpush3.bf16.msra.mxu0 %v1441_v61 }
  0x7a   :  { %1267 = vmatmul.mubr.bf16.vlgmr.msra.gmra.mrb[0].mxu1 %v1770_v9  ;;  %1294 = vmatprep.subr.bf16.mxu0 %v1442_v62 }
  0x7b   :  { %1270 = vmatprep.mubr.bf16.mxu1 %v1772_v11  ;;  %1139 = vmatpush3.bf16.msra.mxu1 %v1421_v12 }
  0x7c   :  { %1140 = vmatprep.subr.bf16.mxu1 %v1422_v13 }
  0x7d   :  { %1295 = vmatpush3.bf16.msra.mxu0 %v1442_v62 }
  0x7e   :  { %1296 = vmatprep.subr.bf16.mxu0 %v1443_v63 }
  0x7f   :  { %1141 = vmatpush3.bf16.msra.mxu1 %v1423_v14 }
  0x80   :  { %1142 = vmatprep.subr.bf16.mxu1 %v1424_v15 }
  0x81   :  { %1297 = vmatpush3.bf16.msra.mxu0 %v1443_v63 }
  0x82   :  { %1271 = vmatmul.mubr.bf16.gmra.mrb[4].mxu1 %v1777_v16 }
  0x83   :  { %1274 = vmatprep.mubr.bf16.mxu1 %v1779_v17  ;;  %1143 = vmatpush3.bf16.msra.mxu1 %v1425_v18 }
  0x84   :  { %1144 = vmatprep.subr.bf16.mxu1 %v1426_v19 }
  0x87   :  { %1145 = vmatpush3.bf16.msra.mxu1 %v1427_v20 }
  0x88   :  { %1146 = vmatprep.subr.bf16.mxu1 %v1428_v21 }
  0x8a   :  { %1275 = vmatmul.mubr.bf16.gmra.mrb[8].mxu1 %v1783_v22 }
  0x8b   :  { %1278 = vmatprep.mubr.bf16.mxu1 %v1785_v23  ;;  %1147 = vmatpush3.bf16.msra.mxu1 %v1429_v24 }
  0x8c   :  { %1148 = vmatprep.subr.bf16.mxu1 %v1430_v25 }
  0x8f   :  { %1149 = vmatpush3.bf16.msra.mxu1 %v1431_v26 }
  0x90   :  { %1150 = vmatprep.subr.bf16.mxu1 %v1432_v27 }
  0x92   :  { %1279 = vmatmul.mubr.bf16.gmra.mrb[12].mxu1 %v1789_v28 }
  0x93   :  { %1151 = vmatpush3.bf16.msra.mxu1 %v1433_v29 }
  0x94   :  { %1152 = vmatprep.subr.bf16.mxu1 %v1434_v30 }
  0x97   :  { %1153 = vmatpush3.bf16.msra.mxu1 %v1435_v31 }
 0x14d   :  { %v1268_v35 = vpop.f32.mrb[0].mxu1 }
 0x14e   :  { %v260_v36 = vpop.f32.mrb[1].mxu1 }
 0x14f   :  { %v1269_v37 = vpop.f32.mrb[2].mxu1 }
 0x150   :  { %v324_v38 = vpack.c.bf16 %v1269_v37, %v1268_v35  ;;  %v263_v39 = vpop.f32.mrb[3].mxu1 }
 0x151   :  { %v323_v40 = vpack.c.bf16 %v263_v39, %v260_v36 }
 0x153   :  { %498 = vmatprep.mubr.bf16.mxu1 %v323_v40 }
 0x154   :  { %499 = vmatmul.mubr.bf16.vlgmr.msra.gmra.mrb[16].mxu1 %v1736_v0 }
 0x155   :  { %506 = vmatprep.mubr.bf16.mxu1 %v324_v38  ;;  %v1272_v41 = vpop.f32.mrb[4].mxu1 }
 0x156   :  { %v276_v42 = vpop.f32.mrb[5].mxu1 }
 0x157   :  { %v1273_v43 = vpop.f32.mrb[6].mxu1 }
 0x158   :  { %v326_v44 = vpack.c.bf16 %v1273_v43, %v1272_v41  ;;  %v279_v45 = vpop.f32.mrb[7].mxu1 }
 0x159   :  { %v325_v46 = vpack.c.bf16 %v279_v45, %v276_v42 }
 0x15c   :  { %507 = vmatmul.mubr.bf16.gmra.mrb[20].mxu1 %v1738_v1  ;;  %v1803_v1 = vld [vmem:[%s1880_s4] ss:$0 sm:$0xff] }
 0x15d   :  { %514 = vmatprep.mubr.bf16.mxu1 %v325_v46  ;;  %v1276_v47 = vpop.f32.mrb[8].mxu1 }
 0x15e   :  { %v292_v48 = vpop.f32.mrb[9].mxu1 }
 0x15f   :  { %v1277_v49 = vpop.f32.mrb[10].mxu1 }
 0x160   :  { %v328_v50 = vpack.c.bf16 %v1277_v49, %v1276_v47  ;;  %v295_v51 = vpop.f32.mrb[11].mxu1 }
 0x161   :  { %v327_v52 = vpack.c.bf16 %v295_v51, %v292_v48 }
 0x164   :  { %515 = vmatmul.mubr.bf16.gmra.mrb[24].mxu1 %v1743_v2 }
 0x165   :  { %522 = vmatprep.mubr.bf16.mxu1 %v326_v44  ;;  %v1280_v53 = vpop.f32.mrb[12].mxu1 }
 0x166   :  { %v308_v54 = vpop.f32.mrb[13].mxu1 }
 0x167   :  { %v1281_v55 = vpop.f32.mrb[14].mxu1 }
 0x168   :  { %v330_v56 = vpack.c.bf16 %v1281_v55, %v1280_v53  ;;  %v311_v57 = vpop.f32.mrb[15].mxu1 }
 0x169   :  { %v329_v58 = vpack.c.bf16 %v311_v57, %v308_v54 }
 0x16c   :  { %523 = vmatmul.mubr.bf16.gmra.mrb[28].mxu1 %v1746_v3 }
 0x16d   :  { %530 = vmatprep.mubr.bf16.mxu1 %v327_v52 }
 0x174   :  { %531 = vmatmul.mubr.bf16.gmra.mrb[32].mxu1 %v1754_v5 }
 0x175   :  { %538 = vmatprep.mubr.bf16.mxu1 %v328_v50 }
 0x17c   :  { %539 = vmatmul.mubr.bf16.gmra.mrb[36].mxu1 %v1758_v6 }
 0x17d   :  { %546 = vmatprep.mubr.bf16.mxu1 %v329_v58 }
 0x184   :  { %547 = vmatmul.mubr.bf16.gmra.mrb[40].mxu1 %v1762_v7 }
 0x185   :  { %554 = vmatprep.mubr.bf16.mxu1 %v330_v56 }
 0x18c   :  { %555 = vmatmul.mubr.bf16.gmra.mrb[44].mxu1 %v1766_v8 }
 0x227   :  { %v1154_v0 = vpop.f32.mrb[16].mxu1 }
 0x228   :  { %v1155_v2 = vpop.f32.mrb[17].mxu1 }
 0x229   :  { %v1156_v3 = vadd.f32 %v1155_v2, %v1154_v0  ;;  %v1157_v5 = vpop.f32.mrb[18].mxu1 }
 0x22a   :  { %v1158_v6 = vpop.f32.mrb[19].mxu1 }
 0x22b   :  { %v501_v7 = vadd.f32 %v1156_v3, %v1803_v1  ;;  %v1159_v8 = vadd.f32 %v1158_v6, %v1157_v5 }
 0x22d   :  { %v504_v10 = vadd.f32 %v1159_v8, %v1803_v1  ;;  %v563_v12 = vmax.f32 %v501_v7, 0.0 }
 0x22f   :  { %v564_v13 = vmax.f32 %v504_v10, 0.0  ;;  %v1160_v14 = vpop.f32.mrb[20].mxu1 }
 0x230   :  { %v1161_v15 = vpop.f32.mrb[21].mxu1 }
 0x231   :  { %v1162_v18 = vadd.f32 %v1161_v15, %v1160_v14  ;;  %v1163_v19 = vpop.f32.mrb[22].mxu1  ;;  %v1807_v20 = vpack.c.bf16 %v564_v13, %v563_v12 }
 0x232   :  { %v1164_v21 = vpop.f32.mrb[23].mxu1 }
 0x233   :  { %v509_v24 = vadd.f32 %v1162_v18, %v1803_v1  ;;  %v1165_v25 = vadd.f32 %v1164_v21, %v1163_v19  ;;  %1298 = vmatprep.mubr.bf16.mxu0 %v1807_v20 }
 0x235   :  { %v512_v26 = vadd.f32 %v1165_v25, %v1803_v1  ;;  %v565_v27 = vmax.f32 %v509_v24, 0.0 }
 0x237   :  { %v566_v29 = vmax.f32 %v512_v26, 0.0  ;;  %v1166_v30 = vpop.f32.mrb[24].mxu1 }
 0x238   :  { %v1167_v31 = vpop.f32.mrb[25].mxu1 }
 0x239   :  { %v1168_v32 = vadd.f32 %v1167_v31, %v1166_v30  ;;  %v1169_v33 = vpop.f32.mrb[26].mxu1  ;;  %v1812_v34 = vpack.c.bf16 %v566_v29, %v565_v27 }
 0x23a   :  { %v1170_v35 = vpop.f32.mrb[27].mxu1 }
 0x23b   :  { %v517_v36 = vadd.f32 %v1168_v32, %v1803_v1  ;;  %v1171_v37 = vadd.f32 %v1170_v35, %v1169_v33  ;;  %1299 = vmatmul.mubr.bf16.vlgmr.msra.gmra.mrb[0].mxu0 %v1812_v34 }
 0x23d   :  { %v520_v38 = vadd.f32 %v1171_v37, %v1803_v1  ;;  %v567_v39 = vmax.f32 %v517_v36, 0.0 }
 0x23f   :  { %v568_v40 = vmax.f32 %v520_v38, 0.0  ;;  %v1172_v41 = vpop.f32.mrb[28].mxu1 }
 0x240   :  { %v1173_v42 = vpop.f32.mrb[29].mxu1 }
 0x241   :  { %v1174_v43 = vadd.f32 %v1173_v42, %v1172_v41  ;;  %v1175_v44 = vpop.f32.mrb[30].mxu1  ;;  %v1817_v45 = vpack.c.bf16 %v568_v40, %v567_v39 }
 0x242   :  { %v1176_v46 = vpop.f32.mrb[31].mxu1 }
 0x243   :  { %v525_v47 = vadd.f32 %v1174_v43, %v1803_v1  ;;  %v1177_v48 = vadd.f32 %v1176_v46, %v1175_v44  ;;  %1302 = vmatprep.mubr.bf16.mxu0 %v1817_v45 }
 0x245   :  { %v528_v49 = vadd.f32 %v1177_v48, %v1803_v1  ;;  %v569_v50 = vmax.f32 %v525_v47, 0.0 }
 0x247   :  { %v570_v51 = vmax.f32 %v528_v49, 0.0  ;;  %v1178_v52 = vpop.f32.mrb[32].mxu1 }
 0x248   :  { %v1179_v53 = vpop.f32.mrb[33].mxu1 }
 0x249   :  { %v1180_v54 = vadd.f32 %v1179_v53, %v1178_v52  ;;  %v1181_v55 = vpop.f32.mrb[34].mxu1  ;;  %v1822_v56 = vpack.c.bf16 %v570_v51, %v569_v50 }
 0x24a   :  { %v1182_v57 = vpop.f32.mrb[35].mxu1 }
 0x24b   :  { %v533_v58 = vadd.f32 %v1180_v54, %v1803_v1  ;;  %v1183_v59 = vadd.f32 %v1182_v57, %v1181_v55  ;;  %1303 = vmatmul.mubr.bf16.gmra.mrb[4].mxu0 %v1822_v56 }
 0x24d   :  { %v536_v60 = vadd.f32 %v1183_v59, %v1803_v1  ;;  %v571_v61 = vmax.f32 %v533_v58, 0.0 }
 0x24f   :  { %v572_v62 = vmax.f32 %v536_v60, 0.0  ;;  %v1184_v63 = vpop.f32.mrb[36].mxu1 }
 0x250   :  { %v1185_v0 = vpop.f32.mrb[37].mxu1 }
 0x251   :  { %v1186_v2 = vadd.f32 %v1185_v0, %v1184_v63  ;;  %v1187_v3 = vpop.f32.mrb[38].mxu1  ;;  %v1827_v5 = vpack.c.bf16 %v572_v62, %v571_v61 }
 0x252   :  { %v1188_v6 = vpop.f32.mrb[39].mxu1 }
 0x253   :  { %v541_v7 = vadd.f32 %v1186_v2, %v1803_v1  ;;  %v1189_v8 = vadd.f32 %v1188_v6, %v1187_v3  ;;  %1306 = vmatprep.mubr.bf16.mxu0 %v1827_v5 }
 0x255   :  { %v544_v10 = vadd.f32 %v1189_v8, %v1803_v1  ;;  %v573_v12 = vmax.f32 %v541_v7, 0.0  ;;  %v1444_v7 = vld [vmem:[#allocation10] sm:$0xff]   ;;  %v1445_v8 = vld [vmem:[#allocation10 + $0x8] sm:$0xff]  }
 0x257   :  { %v574_v13 = vmax.f32 %v544_v10, 0.0  ;;  %v1190_v14 = vpop.f32.mrb[40].mxu1  ;;  %v1446_v10 = vld [vmem:[#allocation10 + $0x10] sm:$0xff]  }
 0x258   :  { %v1191_v15 = vpop.f32.mrb[41].mxu1 }
 0x259   :  { %v1192_v18 = vadd.f32 %v1191_v15, %v1190_v14  ;;  %v1193_v19 = vpop.f32.mrb[42].mxu1  ;;  %v1832_v21 = vpack.c.bf16 %v574_v13, %v573_v12  ;;  %v1447_v12 = vld [vmem:[#allocation10 + $0x18] sm:$0xff]   ;;  %v1448_v13 = vld [vmem:[#allocation10 + $0x20] sm:$0xff]   ;;  %v1449_v14 = vld [vmem:[#allocation10 + $0x28] sm:$0xff]  }
 0x25a   :  { %v1194_v24 = vpop.f32.mrb[43].mxu1 }
 0x25b   :  { %v549_v25 = vadd.f32 %v1192_v18, %v1803_v1  ;;  %v1195_v26 = vadd.f32 %v1194_v24, %v1193_v19  ;;  %1307 = vmatmul.mubr.bf16.gmra.mrb[8].mxu0 %v1832_v21 }
 0x25d   :  { %v552_v27 = vadd.f32 %v1195_v26, %v1803_v1  ;;  %v575_v29 = vmax.f32 %v549_v25, 0.0 }
 0x25f   :  { %v576_v30 = vmax.f32 %v552_v27, 0.0  ;;  %v1196_v31 = vpop.f32.mrb[44].mxu1 }
 0x260   :  { %v1197_v32 = vpop.f32.mrb[45].mxu1 }
 0x261   :  { %v1198_v33 = vadd.f32 %v1197_v32, %v1196_v31  ;;  %v1199_v35 = vpop.f32.mrb[46].mxu1  ;;  %v1837_v36 = vpack.c.bf16 %v576_v30, %v575_v29 }
 0x262   :  { %v1200_v37 = vpop.f32.mrb[47].mxu1 }
 0x263   :  { %v557_v38 = vadd.f32 %v1198_v33, %v1803_v1  ;;  %v1201_v39 = vadd.f32 %v1200_v37, %v1199_v35  ;;  %1310 = vmatprep.mubr.bf16.mxu0 %v1837_v36 }
 0x265   :  { %v560_v40 = vadd.f32 %v1201_v39, %v1803_v1  ;;  %v577_v41 = vmax.f32 %v557_v38, 0.0 }
 0x267   :  { %v578_v42 = vmax.f32 %v560_v40, 0.0 }
 0x269   :  { %v1842_v43 = vpack.c.bf16 %v578_v42, %v577_v41 }
 0x26b   :  { %1311 = vmatmul.mubr.bf16.gmra.mrb[12].mxu0 %v1842_v43 }
 0x26c   :  { %1330 = vmatprep.mubr.bf16.mxu0 %v1749_v4 }
 0x30e   :  { %v1300_v44 = vpop.f32.mrb[0].mxu0 }
 0x30f   :  { %v685_v46 = vpop.f32.mrb[1].mxu0 }
 0x310   :  { %v1301_v47 = vpop.f32.mrb[2].mxu0 }
 0x311   :  { %v749_v48 = vpack.c.bf16 %v1301_v47, %v1300_v44  ;;  %v688_v49 = vpop.f32.mrb[3].mxu0 }
 0x312   :  { %v748_v50 = vpack.c.bf16 %v688_v49, %v685_v46 }
 0x314   :  { %1314 = vmatprep.subr.bf16.mxu0 %v748_v50 }
 0x315   :  { %1315 = vmatpush3.bf16.msra.mxu0 %v748_v50 }
 0x316   :  { %1316 = vmatprep.subr.bf16.mxu0 %v749_v48 }
 0x319   :  { %1317 = vmatpush3.bf16.msra.mxu0 %v749_v48 }
 0x31e   :  { %v1304_v51 = vpop.f32.mrb[4].mxu0 }
 0x31f   :  { %v701_v1 = vpop.f32.mrb[5].mxu0 }
 0x320   :  { %v1305_v52 = vpop.f32.mrb[6].mxu0 }
 0x321   :  { %v751_v53 = vpack.c.bf16 %v1305_v52, %v1304_v51  ;;  %v704_v54 = vpop.f32.mrb[7].mxu0 }
 0x322   :  { %v750_v55 = vpack.c.bf16 %v704_v54, %v701_v1 }
 0x324   :  { %1318 = vmatprep.subr.bf16.mxu0 %v750_v55 }
 0x325   :  { %1319 = vmatpush3.bf16.msra.mxu0 %v750_v55 }
 0x326   :  { %1320 = vmatprep.subr.bf16.mxu0 %v751_v53 }
 0x329   :  { %1321 = vmatpush3.bf16.msra.mxu0 %v751_v53 }
 0x32e   :  { %v1308_v4 = vpop.f32.mrb[8].mxu0 }
 0x32f   :  { %v717_v57 = vpop.f32.mrb[9].mxu0 }
 0x330   :  { %v1309_v58 = vpop.f32.mrb[10].mxu0 }
 0x331   :  { %v753_v59 = vpack.c.bf16 %v1309_v58, %v1308_v4  ;;  %v720_v60 = vpop.f32.mrb[11].mxu0 }
 0x332   :  { %v752_v61 = vpack.c.bf16 %v720_v60, %v717_v57 }
 0x334   :  { %1322 = vmatprep.subr.bf16.mxu0 %v752_v61 }
 0x335   :  { %1323 = vmatpush3.bf16.msra.mxu0 %v752_v61 }
 0x336   :  { %1324 = vmatprep.subr.bf16.mxu0 %v753_v59 }
 0x339   :  { %1325 = vmatpush3.bf16.msra.mxu0 %v753_v59 }
 0x33e   :  { %v1312_v62 = vpop.f32.mrb[12].mxu0 }
 0x33f   :  { %v733_v63 = vpop.f32.mrb[13].mxu0 }
 0x340   :  { %v1313_v0 = vpop.f32.mrb[14].mxu0 }
 0x341   :  { %v755_v2 = vpack.c.bf16 %v1313_v0, %v1312_v62  ;;  %v736_v3 = vpop.f32.mrb[15].mxu0 }
 0x342   :  { %v754_v6 = vpack.c.bf16 %v736_v3, %v733_v63 }
 0x344   :  { %1326 = vmatprep.subr.bf16.mxu0 %v754_v6 }
 0x345   :  { %1327 = vmatpush3.bf16.msra.mxu0 %v754_v6 }
 0x346   :  { %1328 = vmatprep.subr.bf16.mxu0 %v755_v2 }
 0x349   :  { %1329 = vmatpush3.bf16.msra.mxu0 %v755_v2 }
 0x34a   :  { %1346 = vmatprep.subr.bf16.mxu0 %v1444_v7 }
 0x34c   :  { %1331 = vmatmul.mubr.bf16.vlgmr.msra.gmra.mrb[16].mxu0 %v1770_v9  ;;  %v1450_v9 = vld [vmem:[#allocation10 + $0x30] sm:$0xff]  }
 0x34d   :  { %1347 = vmatpush3.bf16.msra.mxu0 %v1444_v7  ;;  %1334 = vmatprep.mubr.bf16.mxu0 %v1772_v11  ;;  %v1451_v11 = vld [vmem:[#allocation10 + $0x38] sm:$0xff]  }
 0x34e   :  { %1348 = vmatprep.subr.bf16.mxu0 %v1445_v8 }
 0x351   :  { %1349 = vmatpush3.bf16.msra.mxu0 %v1445_v8 }
 0x352   :  { %1350 = vmatprep.subr.bf16.mxu0 %v1446_v10 }
 0x354   :  { %1335 = vmatmul.mubr.bf16.gmra.mrb[20].mxu0 %v1777_v16  ;;  %v1121_v16 = vld [vmem:[%s1883_s7] ss:$0 sm:$0xff]  ;;  %s1599_s7 = smov [#allocation13]  }
 0x355   :  { %1351 = vmatpush3.bf16.msra.mxu0 %v1446_v10  ;;  %1338 = vmatprep.mubr.bf16.mxu0 %v1779_v17  ;;  %s1058_s5 = sshll.u32 %s1599_s7, 4  ;;  %s1059_s5 = int_to_ptr.vmem [resolvable:$true] %s1058_s5 }
 0x356   :  { %1352 = vmatprep.subr.bf16.mxu0 %v1447_v12  ;;  %s1562_s29 = scalar_lea.vmem %s1059_s5, 2048  ;;  %p1567_p13 = scmp.lt.s32.totalorder %s1059_s5, %s1059_s5 }
 0x357   :  { %p1563_p12 = scmp.ne.s32.totalorder %s1059_s5, %s1562_s29  ;;  %p1568_p0 = scmp.lt.s32.totalorder %s1562_s29, %s1562_s29 }
 0x359   :  { %1353 = vmatpush3.bf16.msra.mxu0 %v1447_v12  ;;  %p1569_p1 = por %p1568_p0, %p1567_p13 }
 0x35a   :  { %1354 = vmatprep.subr.bf16.mxu0 %v1448_v13 }
 0x35b   :  { %p1570_p2 = pnand %p1569_p1, %p1563_p12 }
 0x35c   :  { %1339 = vmatmul.mubr.bf16.gmra.mrb[24].mxu0 %v1783_v22 }
 0x35d   :  { %1355 = vmatpush3.bf16.msra.mxu0 %v1448_v13  ;;  %1342 = vmatprep.mubr.bf16.mxu0 %v1785_v23 }
 0x35e   :  { %1356 = vmatprep.subr.bf16.mxu0 %v1449_v14 }
 0x361   :  { %1357 = vmatpush3.bf16.msra.mxu0 %v1449_v14 }
 0x362   :  { %1358 = vmatprep.subr.bf16.mxu0 %v1450_v9 }
 0x364   :  { %1343 = vmatmul.mubr.bf16.gmra.mrb[28].mxu0 %v1789_v28 }
 0x365   :  { %1359 = vmatpush3.bf16.msra.mxu0 %v1450_v9  ;;  %1362 = vmatprep.mubr.bf16.mxu0 %v1807_v20 }
 0x366   :  { %1360 = vmatprep.subr.bf16.mxu0 %v1451_v11 }
 0x369   :  { %1361 = vmatpush3.bf16.msra.mxu0 %v1451_v11 }
 0x36c   :  { %1363 = vmatmul.mubr.bf16.vlgmr.msra.gmra.mrb[16].mxu0 %v1812_v34 }
 0x36d   :  { %1366 = vmatprep.mubr.bf16.mxu0 %v1817_v45 }
 0x374   :  { %1367 = vmatmul.mubr.bf16.gmra.mrb[20].mxu0 %v1822_v56 }
 0x375   :  { %1370 = vmatprep.mubr.bf16.mxu0 %v1827_v5 }
 0x37c   :  { %1371 = vmatmul.mubr.bf16.gmra.mrb[24].mxu0 %v1832_v21 }
 0x37d   :  { %1374 = vmatprep.mubr.bf16.mxu0 %v1837_v36 }
 0x384   :  { %1375 = vmatmul.mubr.bf16.gmra.mrb[28].mxu0 %v1842_v43 }
 0x43f   :  { %v1364_v17 = vpop.f32.mrb[16].mxu0 }
 0x440   :  { %v1023_v22 = vadd.f32 %v1364_v17, %v1121_v16  ;;  %v951_v23 = vpop.f32.mrb[17].mxu0 }
 0x441   :  { %v1021_v28 = vadd.f32 %v1121_v16, %v951_v23  ;;  %v1365_v20 = vpop.f32.mrb[18].mxu0 }
 0x442   :  { %1039 = vst [vmem:[#allocation13 + $0x10] sm:$0xff] %v1023_v22  ;;  %v1024_v34 = vadd.f32 %v1365_v20, %v1121_v16  ;;  %v954_v45 = vpop.f32.mrb[19].mxu0 }
 0x443   :  { %1037 = vst [vmem:[#allocation13] sm:$0xff] %v1021_v28  ;;  %v1022_v56 = vadd.f32 %v1121_v16, %v954_v45 }
 0x444   :  { %1040 = vst [vmem:[#allocation13 + $0x18] sm:$0xff] %v1024_v34 }
 0x445   :  { %1038 = vst [vmem:[#allocation13 + $0x8] sm:$0xff] %v1022_v56 }
 0x447   :  { %v1368_v5 = vpop.f32.mrb[20].mxu0 }
 0x448   :  { %v1027_v15 = vadd.f32 %v1368_v5, %v1121_v16  ;;  %v967_v18 = vpop.f32.mrb[21].mxu0 }
 0x449   :  { %v1025_v19 = vadd.f32 %v1121_v16, %v967_v18  ;;  %v1369_v21 = vpop.f32.mrb[22].mxu0 }
 0x44a   :  { %1043 = vst [vmem:[#allocation13 + $0x30] sm:$0xff] %v1027_v15  ;;  %v1028_v24 = vadd.f32 %v1369_v21, %v1121_v16  ;;  %v970_v25 = vpop.f32.mrb[23].mxu0 }
 0x44b   :  { %1041 = vst [vmem:[#allocation13 + $0x20] sm:$0xff] %v1025_v19  ;;  %v1026_v26 = vadd.f32 %v1121_v16, %v970_v25 }
 0x44c   :  { %1044 = vst [vmem:[#allocation13 + $0x38] sm:$0xff] %v1028_v24 }
 0x44d   :  { %1042 = vst [vmem:[#allocation13 + $0x28] sm:$0xff] %v1026_v26 }
 0x44f   :  { %v1372_v27 = vpop.f32.mrb[24].mxu0 }
 0x450   :  { %v1031_v29 = vadd.f32 %v1372_v27, %v1121_v16  ;;  %v983_v30 = vpop.f32.mrb[25].mxu0 }
 0x451   :  { %v1029_v31 = vadd.f32 %v1121_v16, %v983_v30  ;;  %v1373_v32 = vpop.f32.mrb[26].mxu0 }
 0x452   :  { %1047 = vst [vmem:[#allocation13 + $0x50] sm:$0xff] %v1031_v29  ;;  %v1032_v33 = vadd.f32 %v1373_v32, %v1121_v16  ;;  %v986_v35 = vpop.f32.mrb[27].mxu0 }
 0x453   :  { %1045 = vst [vmem:[#allocation13 + $0x40] sm:$0xff] %v1029_v31  ;;  %v1030_v36 = vadd.f32 %v1121_v16, %v986_v35 }
 0x454   :  { %1048 = vst [vmem:[#allocation13 + $0x58] sm:$0xff] %v1032_v33 }
 0x455   :  { %1046 = vst [vmem:[#allocation13 + $0x48] sm:$0xff] %v1030_v36 }
 0x457   :  { %v1376_v37 = vpop.f32.mrb[28].mxu0 }
 0x458   :  { %v1035_v38 = vadd.f32 %v1376_v37, %v1121_v16  ;;  %v999_v39 = vpop.f32.mrb[29].mxu0 }
 0x459   :  { %v1033_v40 = vadd.f32 %v1121_v16, %v999_v39  ;;  %v1377_v41 = vpop.f32.mrb[30].mxu0 }
 0x45a   :  { %1051 = vst [vmem:[#allocation13 + $0x70] sm:$0xff] %v1035_v38  ;;  %v1036_v42 = vadd.f32 %v1377_v41, %v1121_v16  ;;  %v1002_v43 = vpop.f32.mrb[31].mxu0 }
 0x45b   :  { %1049 = vst [vmem:[#allocation13 + $0x60] sm:$0xff] %v1033_v40  ;;  %v1034_v44 = vadd.f32 %v1121_v16, %v1002_v43 }
 0x45c   :  { %1052 = vst [vmem:[#allocation13 + $0x78] sm:$0xff] %v1036_v42 }
 0x45d   :  { %1050 = vst [vmem:[#allocation13 + $0x68] sm:$0xff] %v1034_v44 }
 0x45e   :  { %1573 = shalt.err (!%p1570_p2)
}
 0x45f   :  { %s1574_s22 = scalar_lea.hbm %s1884_s8, 2048 }
 0x460   :  { %p1575_p3 = scmp.ne.s32.totalorder %s1884_s8, %s1574_s22  ;;  %p1578_p4 = scmp.lt.u32.totalorder %s1574_s22, %s1884_s8 }
 0x462   :  { %p1580_p5 = pnand %p1578_p4, %p1575_p3 }
 0x464   :  { %1583 = shalt.err (!%p1580_p5)
}
 0x465   :  { %s1600_s26 = smov 128   ;;  %s1601_s2 = smov 8  }
 0x466   :  { %1064 = dma.vmem_to_hbm [thread:$0]  %s1059_s5, 2048, %s1884_s8, [#allocation6], %s1600_s26, %s1600_s26, %s1601_s2  }
 0x467   :  { %1590 = dma.done.wait [#allocation6], 2048  }
 0x468   :  { %1591 = vsyncadd [#allocation6], 4294965248 }
 0x469   :  { %1068 = vsyncpa [#allocation5], 1 }
 0x46a   :  { %1069 = vsyncpa [#allocation8], 1 }
 0x46b   :  { %1070 = vsyncpa [#allocation11], 1 }
 0x46c   :  { %1071 = vsyncpa [#allocation6], 1 }

</bundles_post_ra>
